<compile_context>
chip_gen: v6e
topology: v6e:2x2x1
jax: 0.10.0
libtpu: 0.0.40
codegen_flags: <defaults>
</compile_context>

<pallas_src>
import math
import jax
import jax.numpy as jnp
from jax.experimental import pallas as pl
from jax.experimental.pallas import tpu as pltpu

IN_FEATURES = 512
OUT_FEATURES = 2
_LANE = 128
_SUBLANE = 8


def _round_up(x, m):
    return ((x + m - 1) // m) * m


def _linear_kernel(x_ref, wt_ref, o_ref):
    # x_ref: (tm, 512) VMEM tile; wt_ref: (512, 2) pre-transposed weight; o_ref: (tm, 2)
    o_ref[...] = jnp.dot(
        x_ref[...], wt_ref[...], preferred_element_type=jnp.float32
    ).astype(o_ref.dtype)


def _vmem_capacity_bytes():
    try:
        return int(pltpu.get_tpu_info().vmem_capacity_bytes)
    except Exception:
        return 64 << 20  # conservative (v7x per-TC size)


def multi_reg_forward(x, weight, *, tm=None):
    """Pallas implementation of MultiRegModule.forward (bias-free linear)."""
    n, d = x.shape
    assert d == IN_FEATURES
    assert weight.shape == (OUT_FEATURES, IN_FEATURES)

    itemsize = jnp.dtype(x.dtype).itemsize
    vmem_cap = _vmem_capacity_bytes()

    # --- choose the row tile ---------------------------------------------
    if tm is None:
        # Per-row VMEM cost across double-buffered, lane-padded tiles:
        #   X tile: 2 * 512 * itemsize ; output tile (lane-padded to 128): 2 * 128 * 4
        per_row = 2 * IN_FEATURES * itemsize + 2 * _LANE * 4
        w_bytes = 2 * IN_FEATURES * _LANE * 4          # double-buffered padded weight
        budget = vmem_cap // 2
        tm = max(_SUBLANE, min(8192, (budget - w_bytes) // per_row))
        tm = (tm // _SUBLANE) * _SUBLANE

    if n >= _SUBLANE:
        # Keep at least 2 grid steps when the batch allows it (both TCs busy on v7x).
        half = _round_up(-(-n // 2), _SUBLANE)
        tm_eff = max(_SUBLANE, (min(tm, half) // _SUBLANE) * _SUBLANE)
    else:
        tm_eff = n  # block equals the full (tiny) first dim

    grid = (pl.cdiv(n, tm_eff),)

    # --- VMEM limit from (8,128)-padded layouts ---------------------------
    x_tile_b = tm_eff * IN_FEATURES * itemsize                    # lane-dense already
    w_tile_b = IN_FEATURES * _LANE * 4                            # (512,2) pads to (512,128)
    o_tile_b = _round_up(tm_eff, _SUBLANE) * _LANE * 4            # (tm,2) pads to (tm,128)
    vmem_needed = 2 * x_tile_b + 2 * w_tile_b + 2 * o_tile_b
    vmem_limit = int(min(max(vmem_needed + (4 << 20), 8 << 20),
                         (vmem_cap * 3) // 4))
    vmem_limit = max(vmem_limit, vmem_needed)

    # Hoist the transpose out of the kernel (one-time cost in the wrapper).
    wt = weight.T  # (512, 2)

    cost = pl.CostEstimate(
        flops=2 * n * IN_FEATURES * OUT_FEATURES,
        bytes_accessed=(n * IN_FEATURES * itemsize
                        + IN_FEATURES * OUT_FEATURES * 4
                        + n * OUT_FEATURES * itemsize),
        transcendentals=0,
    )

    return pl.pallas_call(
        _linear_kernel,
        out_shape=jax.ShapeDtypeStruct((n, OUT_FEATURES), x.dtype),
        grid_spec=pltpu.PrefetchScalarGridSpec(
            num_scalar_prefetch=0,
            grid=grid,
            in_specs=[
                pl.BlockSpec((tm_eff, IN_FEATURES), lambda i: (i, 0)),
                pl.BlockSpec((IN_FEATURES, OUT_FEATURES), lambda i: (0, 0)),
            ],
            out_specs=pl.BlockSpec((tm_eff, OUT_FEATURES), lambda i: (i, 0)),
        ),
        compiler_params=pltpu.CompilerParams(
            dimension_semantics=("parallel",),
            vmem_limit_bytes=vmem_limit,
        ),
        cost_estimate=cost,
    )(x, wt)


class MultiRegModuleJAX:
    """Minimal JAX port; forward pass runs in the Pallas kernel above."""

    def __init__(self, *, qvec, reg_norm_lambda, reg_query_lambda,
                 max_iter=100, lr=1.0):
        qnorm = jnp.linalg.norm(qvec.reshape(-1))
        assert not math.isclose(float(qnorm), 0.0)
        self.qvec = qvec.reshape(-1) / qnorm  # F.normalize(qvec, dim=-1)
        # nn.Linear(512, 2, bias=False) weight: deterministic init in
        # [-1/sqrt(512), 1/sqrt(512)] (kaiming-uniform-like bounds; not the
        # same draw as torch's RNG — load weights explicitly for parity).
        key = jax.random.PRNGKey(42)
        bound = 1.0 / math.sqrt(IN_FEATURES)
        self.weight = jax.random.uniform(
            key, (OUT_FEATURES, IN_FEATURES),
            minval=-bound, maxval=bound, dtype=jnp.float32)
        self.reg_norm_lambda = reg_norm_lambda
        self.reg_query_lambda = reg_query_lambda
        self.max_iter = max_iter
        self.lr = lr

    def forward(self, X, y=None):
        return multi_reg_forward(X, self.weight)

    # TODO(synk): _step / fit / configure_optimizers (LBFGS training loop) are
    # optimizer-side logic, not part of the forward pass; not implemented as kernels.


if __name__ == "__main__":
    key = jax.random.PRNGKey(0)
    k_x, k_q, k_x2 = jax.random.split(key, 3)

    # Small batch (module fixes in_features=512).
    N = 8
    X = jax.random.normal(k_x, (N, IN_FEATURES), dtype=jnp.float32)
    qvec = jax.random.normal(k_q, (IN_FEATURES,), dtype=jnp.float32)

    mod = MultiRegModuleJAX(qvec=qvec, reg_norm_lambda=0.1,
                            reg_query_lambda=0.1)

    out = jax.block_until_ready(mod.forward(X))
    ref = X @ mod.weight.T
    assert out.shape == (N, OUT_FEATURES)
    assert jnp.allclose(out, ref, atol=1e-4, rtol=1e-4)

    # Ragged batch: exercises cdiv grid + partial last block (no wrapper padding).
    N2 = 100
    X2 = jax.random.normal(k_x2, (N2, IN_FEATURES), dtype=jnp.float32)
    out2 = jax.block_until_ready(mod.forward(X2))
    ref2 = X2 @ mod.weight.T
    assert out2.shape == (N2, OUT_FEATURES)
    assert jnp.allclose(out2, ref2, atol=1e-4, rtol=1e-4)

    print("KERNEL_OK")
</pallas_src>

<mosaic_0001>
module attributes {stable_mosaic.version = 11 : i64} {
  func.func @_linear_kernel(%arg0: i32, %arg1: memref<8x512xf32, #tpu.memory_space<vmem>>, %arg2: memref<512x2xf32, #tpu.memory_space<vmem>>, %arg3: memref<8x2xf32, #tpu.memory_space<vmem>>) attributes {dimension_semantics = [#tpu.dimension_semantics<parallel>], iteration_bounds = array<i64: 1>, scalar_prefetch = 0 : i64, scratch_operands = 0 : i64, tpu.core_type = #tpu.core_type<tc>, window_params = [{transform_indices = @transform_0, window_bounds = array<i64: 8, 512>}, {pipeline_mode = #tpu.pipeline_mode<synchronous>, transform_indices = @transform_1, window_bounds = array<i64: 512, 2>}, {transform_indices = @transform_2, window_bounds = array<i64: 8, 2>}]} {
    %c0 = arith.constant 0 : index
    %c0_0 = arith.constant 0 : index
    %0 = vector.load %arg1[%c0, %c0_0] : memref<8x512xf32, #tpu.memory_space<vmem>>, vector<8x512xf32>
    %c0_1 = arith.constant 0 : index
    %c0_2 = arith.constant 0 : index
    %1 = vector.load %arg2[%c0_1, %c0_2] : memref<512x2xf32, #tpu.memory_space<vmem>>, vector<512x2xf32>
    %cst = arith.constant dense<0.000000e+00> : vector<8x2xf32>
    %2 = tpu.matmul %0, %1, %cst {dimension_numbers = #tpu.dot_dimension_numbers<[1], [0], [0], [1], [0, 0, 1, 1], [], []>} : vector<8x512xf32>, vector<512x2xf32>, vector<8x2xf32> -> vector<8x2xf32>
    %c0_3 = arith.constant 0 : index
    %c0_4 = arith.constant 0 : index
    %3 = vector.load %arg3[%c0_3, %c0_4] : memref<8x2xf32, #tpu.memory_space<vmem>>, vector<8x2xf32>
    tpu.vector_store %arg3[%c0_3, %c0_4], %2 {strides = array<i32>} : memref<8x2xf32, #tpu.memory_space<vmem>>, vector<8x2xf32>,
    return
  }
  func.func @transform_0(%arg0: i32) -> (i32, i32) {
    %c0_i32 = arith.constant 0 : i32
    %c0_i32_0 = arith.constant 0 : i32
    return %arg0, %c0_i32 : i32, i32
  }
  func.func @transform_1(%arg0: i32) -> (i32, i32) {
    %c0_i32 = arith.constant 0 : i32
    %c0_i32_0 = arith.constant 0 : i32
    %c0_i32_1 = arith.constant 0 : i32
    return %c0_i32, %c0_i32_0 : i32, i32
  }
  func.func @transform_2(%arg0: i32) -> (i32, i32) {
    %c0_i32 = arith.constant 0 : i32
    %c0_i32_0 = arith.constant 0 : i32
    return %arg0, %c0_i32 : i32, i32
  }
}

</mosaic_0001>

<bundles_post_ra>
// kernel: tpu_custom_call.1
= control target key start
LH: loop header
LB: loop body
LE: loop exit
PB: predicated region body
PF: predicated region fallthrough
CT: control target
= control target key end

     0   :  { %vm219_vm0 = vcmask 15360   ;;  %s517_s1 = inlined_call_operand.vmem [shape: f32[512,2], index: 1, kind: input, shape index: {}]   ;;  %s518_s0 = inlined_call_operand.vmem [shape: f32[8,512], index: 0, kind: input, shape index: {}]   ;;  %s519_s2 = inlined_call_operand.vmem [shape: f32[8,2], index: 2, kind: output, shape index: {}]  }
   0x1   :  { %v46_v0 = vld [vmem:[%s517_s1 + $0xf8] sm:$0xff]  ;;  %v45_v4 = vld [vmem:[%s517_s1 + $0xf0] sm:$0xff]  ;;  %v44_v8 = vld [vmem:[%s517_s1 + $0xe8] sm:$0xff] }
   0x2   :  { %v78_v1 = vld [vmem:[%s517_s1 + $0x1f8] sm:$0xff]  ;;  %225 = vmatprep.subr.mxu0 %v46_v0  ;;  %v77_v5 = vld [vmem:[%s517_s1 + $0x1f0] sm:$0xff]  ;;  %v76_v9 = vld [vmem:[%s517_s1 + $0x1e8] sm:$0xff] }
   0x3   :  { %v30_v2 = vld [vmem:[%s517_s1 + $0x78] sm:$0xff]  ;;  %260 = vmatprep.subr.mxu1 %v78_v1  ;;  %v29_v6 = vld [vmem:[%s517_s1 + $0x70] sm:$0xff]  ;;  %v28_v10 = vld [vmem:[%s517_s1 + $0x68] sm:$0xff] }
   0x4   :  { %v62_v3 = vld [vmem:[%s517_s1 + $0x178] sm:$0xff]  ;;  %226 = vmatpush3.msra.mxu0 %v30_v2  ;;  %v61_v7 = vld [vmem:[%s517_s1 + $0x170] sm:$0xff]  ;;  %v60_v11 = vld [vmem:[%s517_s1 + $0x168] sm:$0xff] }
   0x5   :  { %261 = vmatpush3.msra.mxu1 %v62_v3  ;;  %227 = vmatprep.subr.mxu0 %v45_v4  ;;  %v43_v12 = vld [vmem:[%s517_s1 + $0xe0] sm:$0xff]  ;;  %v42_v16 = vld [vmem:[%s517_s1 + $0xd8] sm:$0xff]  ;;  %v41_v20 = vld [vmem:[%s517_s1 + $0xd0] sm:$0xff] }
   0x6   :  { %262 = vmatprep.subr.mxu1 %v77_v5  ;;  %228 = vmatpush3.msra.mxu0 %v29_v6  ;;  %v75_v13 = vld [vmem:[%s517_s1 + $0x1e0] sm:$0xff]  ;;  %v74_v17 = vld [vmem:[%s517_s1 + $0x1d8] sm:$0xff]  ;;  %v73_v21 = vld [vmem:[%s517_s1 + $0x1d0] sm:$0xff] }
   0x7   :  { %263 = vmatpush3.msra.mxu1 %v61_v7  ;;  %229 = vmatprep.subr.mxu0 %v44_v8  ;;  %v27_v14 = vld [vmem:[%s517_s1 + $0x60] sm:$0xff]  ;;  %v26_v18 = vld [vmem:[%s517_s1 + $0x58] sm:$0xff]  ;;  %v25_v22 = vld [vmem:[%s517_s1 + $0x50] sm:$0xff] }
   0x8   :  { %264 = vmatprep.subr.mxu1 %v76_v9  ;;  %v59_v15 = vld [vmem:[%s517_s1 + $0x160] sm:$0xff]  ;;  %230 = vmatpush3.msra.mxu0 %v28_v10  ;;  %v58_v19 = vld [vmem:[%s517_s1 + $0x158] sm:$0xff]  ;;  %v57_v23 = vld [vmem:[%s517_s1 + $0x150] sm:$0xff] }
   0x9   :  { %265 = vmatpush3.msra.mxu1 %v60_v11  ;;  %231 = vmatprep.subr.mxu0 %v43_v12  ;;  %v40_v24 = vld [vmem:[%s517_s1 + $0xc8] sm:$0xff]  ;;  %v39_v28 = vld [vmem:[%s517_s1 + $0xc0] sm:$0xff]  ;;  %v38_v32 = vld [vmem:[%s517_s1 + $0xb8] sm:$0xff] }
   0xa   :  { %266 = vmatprep.subr.mxu1 %v75_v13  ;;  %232 = vmatpush3.msra.mxu0 %v27_v14  ;;  %v72_v25 = vld [vmem:[%s517_s1 + $0x1c8] sm:$0xff]  ;;  %v71_v29 = vld [vmem:[%s517_s1 + $0x1c0] sm:$0xff]  ;;  %v70_v33 = vld [vmem:[%s517_s1 + $0x1b8] sm:$0xff] }
   0xb   :  { %267 = vmatpush3.msra.mxu1 %v59_v15  ;;  %233 = vmatprep.subr.mxu0 %v42_v16  ;;  %v24_v26 = vld [vmem:[%s517_s1 + $0x48] sm:$0xff]  ;;  %v23_v30 = vld [vmem:[%s517_s1 + $0x40] sm:$0xff]  ;;  %v22_v34 = vld [vmem:[%s517_s1 + $0x38] sm:$0xff] }
   0xc   :  { %268 = vmatprep.subr.mxu1 %v74_v17  ;;  %234 = vmatpush3.msra.mxu0 %v26_v18  ;;  %v56_v27 = vld [vmem:[%s517_s1 + $0x148] sm:$0xff]  ;;  %v55_v31 = vld [vmem:[%s517_s1 + $0x140] sm:$0xff]  ;;  %v54_v35 = vld [vmem:[%s517_s1 + $0x138] sm:$0xff] }
   0xd   :  { %269 = vmatpush3.msra.mxu1 %v58_v19  ;;  %235 = vmatprep.subr.mxu0 %v41_v20  ;;  %v37_v36 = vld [vmem:[%s517_s1 + $0xb0] sm:$0xff]  ;;  %v36_v40 = vld [vmem:[%s517_s1 + $0xa8] sm:$0xff]  ;;  %v35_v44 = vld [vmem:[%s517_s1 + $0xa0] sm:$0xff] }
   0xe   :  { %270 = vmatprep.subr.mxu1 %v73_v21  ;;  %236 = vmatpush3.msra.mxu0 %v25_v22  ;;  %v69_v37 = vld [vmem:[%s517_s1 + $0x1b0] sm:$0xff]  ;;  %v68_v41 = vld [vmem:[%s517_s1 + $0x1a8] sm:$0xff]  ;;  %v67_v45 = vld [vmem:[%s517_s1 + $0x1a0] sm:$0xff] }
   0xf   :  { %271 = vmatpush3.msra.mxu1 %v57_v23  ;;  %237 = vmatprep.subr.mxu0 %v40_v24  ;;  %v21_v38 = vld [vmem:[%s517_s1 + $0x30] sm:$0xff]  ;;  %v20_v42 = vld [vmem:[%s517_s1 + $0x28] sm:$0xff]  ;;  %v19_v46 = vld [vmem:[%s517_s1 + $0x20] sm:$0xff] }
  0x10   :  { %272 = vmatprep.subr.mxu1 %v72_v25  ;;  %238 = vmatpush3.msra.mxu0 %v24_v26  ;;  %v53_v39 = vld [vmem:[%s517_s1 + $0x130] sm:$0xff]  ;;  %v52_v43 = vld [vmem:[%s517_s1 + $0x128] sm:$0xff]  ;;  %v51_v47 = vld [vmem:[%s517_s1 + $0x120] sm:$0xff] }
  0x11   :  { %273 = vmatpush3.msra.mxu1 %v56_v27  ;;  %239 = vmatprep.subr.mxu0 %v39_v28  ;;  %v34_v48 = vld [vmem:[%s517_s1 + $0x98] sm:$0xff]  ;;  %v33_v52 = vld [vmem:[%s517_s1 + $0x90] sm:$0xff]  ;;  %v32_v56 = vld [vmem:[%s517_s1 + $0x88] sm:$0xff] }
  0x12   :  { %274 = vmatprep.subr.mxu1 %v71_v29  ;;  %240 = vmatpush3.msra.mxu0 %v23_v30  ;;  %v66_v49 = vld [vmem:[%s517_s1 + $0x198] sm:$0xff]  ;;  %v65_v53 = vld [vmem:[%s517_s1 + $0x190] sm:$0xff]  ;;  %v64_v57 = vld [vmem:[%s517_s1 + $0x188] sm:$0xff] }
  0x13   :  { %275 = vmatpush3.msra.mxu1 %v55_v31  ;;  %241 = vmatprep.subr.mxu0 %v38_v32  ;;  %v18_v50 = vld [vmem:[%s517_s1 + $0x18] sm:$0xff]  ;;  %v17_v54 = vld [vmem:[%s517_s1 + $0x10] sm:$0xff]  ;;  %v16_v58 = vld [vmem:[%s517_s1 + $0x8] sm:$0xff] }
  0x14   :  { %276 = vmatprep.subr.mxu1 %v70_v33  ;;  %242 = vmatpush3.msra.mxu0 %v22_v34  ;;  %v50_v51 = vld [vmem:[%s517_s1 + $0x118] sm:$0xff]  ;;  %v49_v55 = vld [vmem:[%s517_s1 + $0x110] sm:$0xff]  ;;  %v48_v59 = vld [vmem:[%s517_s1 + $0x108] sm:$0xff] }
  0x15   :  { %277 = vmatpush3.msra.mxu1 %v54_v35  ;;  %243 = vmatprep.subr.mxu0 %v37_v36  ;;  %v31_v60 = vld [vmem:[%s517_s1 + $0x80] sm:$0xff]  ;;  %v12_v63 = vld [vmem:[%s518_s0 + $0x8] sm:$0xff]  ;;  %v14_v1 = vld [vmem:[%s518_s0 + $0x18] sm:$0xff] }
  0x16   :  { %278 = vmatprep.subr.mxu1 %v69_v37  ;;  %244 = vmatpush3.msra.mxu0 %v21_v38  ;;  %v63_v61 = vld [vmem:[%s517_s1 + $0x180] sm:$0xff]  ;;  %v13_v3 = vld [vmem:[%s518_s0 + $0x10] sm:$0xff] }
  0x17   :  { %279 = vmatpush3.msra.mxu1 %v53_v39  ;;  %245 = vmatprep.subr.mxu0 %v36_v40  ;;  %v15_v62 = vld [vmem:[%s517_s1] sm:$0xff] }
  0x18   :  { %280 = vmatprep.subr.mxu1 %v68_v41  ;;  %246 = vmatpush3.msra.mxu0 %v20_v42  ;;  %v47_v0 = vld [vmem:[%s517_s1 + $0x100] sm:$0xff] }
  0x19   :  { %281 = vmatpush3.msra.mxu1 %v52_v43  ;;  %247 = vmatprep.subr.mxu0 %v35_v44  ;;  %v11_v2 = vld [vmem:[%s518_s0] sm:$0xff] }
  0x1a   :  { %282 = vmatprep.subr.mxu1 %v67_v45  ;;  %248 = vmatpush3.msra.mxu0 %v19_v46 }
  0x1b   :  { %283 = vmatpush3.msra.mxu1 %v51_v47  ;;  %249 = vmatprep.subr.mxu0 %v34_v48 }
  0x1c   :  { %284 = vmatprep.subr.mxu1 %v66_v49  ;;  %250 = vmatpush3.msra.mxu0 %v18_v50 }
  0x1d   :  { %285 = vmatpush3.msra.mxu1 %v50_v51  ;;  %251 = vmatprep.subr.mxu0 %v33_v52 }
  0x1e   :  { %286 = vmatprep.subr.mxu1 %v65_v53  ;;  %252 = vmatpush3.msra.mxu0 %v17_v54 }
  0x1f   :  { %287 = vmatpush3.msra.mxu1 %v49_v55  ;;  %253 = vmatprep.subr.mxu0 %v32_v56 }
  0x20   :  { %288 = vmatprep.subr.mxu1 %v64_v57  ;;  %254 = vmatpush3.msra.mxu0 %v16_v58 }
  0x21   :  { %289 = vmatpush3.msra.mxu1 %v48_v59  ;;  %255 = vmatprep.subr.mxu0 %v31_v60 }
  0x22   :  { %290 = vmatprep.subr.mxu1 %v63_v61  ;;  %256 = vmatpush3.msra.mxu0 %v15_v62 }
  0x23   :  { %143 = vmatprep.mubr.f32.mxu0 %v12_v63  ;;  %291 = vmatpush3.msra.mxu1 %v47_v0 }
  0x24   :  { %213 = vmatprep.mubr.f32.mxu1 %v14_v1  ;;  %144 = vmatmul.mubr.f32.vlgmr.msra.gmra.mxu0 %v11_v2 }
  0x25   :  { %214 = vmatmul.mubr.f32.vlgmr.msra.gmra.mxu1 %v13_v3 }
  0xe4   :  { %v257_v4 = vpop.f32.mrf.mxu0 }
  0xe5   :  { %v292_v5 = vpop.f32.mrf.mxu1 }
  0xe6   :  { %v258_v6 = vpop.f32.mrf.mxu0 }
  0xe7   :  { %v293_v7 = vpop.f32.mrf.mxu1  ;;  %v259_v8 = vadd.f32 %v258_v6, %v257_v4 }
  0xe8   :  { %v294_v9 = vadd.f32 %v293_v7, %v292_v5 }
  0xea   :  { %v216_v10 = vadd.f32 %v294_v9, %v259_v8 }
  0xec   :  { %220 = vst.msk [vmem:[%s519_s2] sm:$0xff] %vm219_vm0, %v216_v10 }

</bundles_post_ra>
